<compile_context>
chip_gen: v7x
topology: tpu7x:2x2x1
jax: 0.10.0
libtpu: 0.0.40
codegen_flags: <defaults>
</compile_context>

<pallas_src>
import jax
import jax.numpy as jnp
from jax import lax
from jax.experimental import pallas as pl
from jax.experimental.pallas import tpu as pltpu


def _attention_kernel(x_ref, w_ref, pv_ref, bv_ref, logits_ref, ptr_ref):
    # x_ref:  (bb*S, E+D) bf16        w_ref:  (E+D, H) bf16
    # pv_ref: (2, H) f32   (row 0 = b1+b2, row 1 = v)
    # bv_ref: (1,) f32 in SMEM
    # logits_ref: (bb, S) f32         ptr_ref: (bb, 1) i32
    bb, S = logits_ref.shape
    H = w_ref.shape[1]

    # Whole pre-tanh path is one MXU matmul (bf16 operands, f32 accumulation).
    pre = jnp.dot(x_ref[...], w_ref[...],
                  preferred_element_type=jnp.float32)           # (bb*S, H) f32
    pre = pre + pv_ref[0:1, :]                                  # fused b1 + b2 (f32)
    t = jnp.tanh(pre)                                           # f32 on the EUP

    # V projection as VPU multiply + lane reduce (keeps the degenerate N=1
    # matmul off the MXU).  The reshape is layout-free: f32 sublane tile is 8
    # and bb*S is a multiple of 8 (or the full extent).
    # TODO(synk): with H=32 only 32/128 lanes are live through tanh/reduce;
    # packing 4 sequence positions per vreg (block-diagonal v) would recover
    # lane occupancy if this post-matmul stage ever dominates.
    t3 = t.reshape(bb, S, H)
    lg = jnp.sum(t3 * pv_ref[1:2, :], axis=-1) + bv_ref[0]      # (bb, S) f32
    logits_ref[...] = lg

    # argmax(softmax(x)) == argmax(x): take the argmax directly on the logits
    # (first occurrence, matching torch/jnp semantics).  NOTE: an all-NaN row
    # would fall through to index S; fine for finite inputs.
    mx = jnp.max(lg, axis=-1, keepdims=True)                    # (bb, 1)
    idx = lax.broadcasted_iota(jnp.int32, (bb, S), 1)
    ptr_ref[...] = jnp.min(jnp.where(lg >= mx, idx, jnp.int32(S)),
                           axis=-1, keepdims=True)              # (bb, 1) i32


def _pick_batch_block(B, S, target_rows=1024):
    """Largest multiple-of-8 divisor of B giving ~target_rows rows per block."""
    if B % 8 != 0:
        return B            # tiny/ragged batch: single block (full-dims BlockSpec)
    bb = max(8, min(B, (target_rows // max(S, 1)) // 8 * 8))
    while B % bb:
        bb -= 8
    return bb


def attention_forward(decoder_output, encoder_outputs, params, *, batch_block=None):
    """decoder_output: (B, 1, D) f32; encoder_outputs: (B, S, E) f32.

    Returns (logits (B, S) f32, pointer (B,) int32).
    """
    B, S, E = encoder_outputs.shape
    D = decoder_output.shape[-1]
    H = params["w1"].shape[0]            # 32, fixed by the module
    K = E + D

    bb = batch_block if batch_block is not None else _pick_batch_block(B, S)
    assert B % bb == 0, "batch_block must divide the batch"
    rows = bb * S
    grid = (B // bb,)

    # Fused, pre-tiled activation: decoder row replicated over S and concatenated
    # with the encoder features -> one (rows, E+D) bf16 MXU operand per block.
    # TODO(synk): when this module runs inside a decoder loop, hoist the encoder
    # half (W1 @ enc + b1) out of the per-step call and pass enc_proj instead of
    # re-reading/recomputing it every decode step.
    dec_rep = jnp.broadcast_to(decoder_output, (B, S, D))
    x2d = (jnp.concatenate([encoder_outputs, dec_rep], axis=-1)
           .reshape(B * S, K).astype(jnp.bfloat16))

    w_aug = jnp.concatenate([params["w1"].T, params["w2"].T],
                            axis=0).astype(jnp.bfloat16)          # (K, H) bf16
    pv = jnp.stack([params["b1"] + params["b2"],
                    params["v"].reshape(H)]).astype(jnp.float32)  # (2, H) f32
    bv = params["bv"].astype(jnp.float32).reshape(1)              # SMEM scalar

    grid_spec = pltpu.PrefetchScalarGridSpec(
        num_scalar_prefetch=0,
        grid=grid,
        in_specs=[
            pl.BlockSpec((rows, K), lambda i: (i, 0)),            # activation block
            pl.BlockSpec((K, H), lambda i: (0, 0)),               # fused weight
            pl.BlockSpec((2, H), lambda i: (0, 0)),               # [b1+b2 ; v]
            pl.BlockSpec(memory_space=pltpu.MemorySpace.SMEM),    # bV scalar
        ],
        out_specs=(
            pl.BlockSpec((bb, S), lambda i: (i, 0)),              # logits, S on lanes
            pl.BlockSpec((bb, 1), lambda i: (i, 0)),              # pointer column
        ),
    )

    logits, ptr2 = pl.pallas_call(
        _attention_kernel,
        out_shape=(
            jax.ShapeDtypeStruct((B, S), jnp.float32),
            jax.ShapeDtypeStruct((B, 1), jnp.int32),
        ),
        grid_spec=grid_spec,
        compiler_params=pltpu.CompilerParams(
            dimension_semantics=("parallel",),    # v7x: shard blocks over both TCs
        ),
    )(x2d, w_aug, pv, bv)

    return logits, ptr2[:, 0]                     # pointer (B,) int32 (torch: int64)


# ----------------------------------------------------------------------------
# References for verification.
# ----------------------------------------------------------------------------
def _reference_f32(decoder_output, encoder_outputs, params):
    h = (encoder_outputs @ params["w1"].T + params["b1"]
         + decoder_output @ params["w2"].T + params["b2"])
    t = jnp.tanh(h)
    logits = (t @ params["v"].T + params["bv"])[..., 0]
    pointer = jnp.argmax(jax.nn.softmax(logits, axis=1), axis=1).astype(jnp.int32)
    return logits, pointer


def _reference_bf16_matmul(decoder_output, encoder_outputs, params):
    # Same math as the kernel: bf16 MXU inputs, f32 accumulation, f32 epilogue.
    B, S, E = encoder_outputs.shape
    D = decoder_output.shape[-1]
    dec = jnp.broadcast_to(decoder_output, (B, S, D))
    x = jnp.concatenate([encoder_outputs, dec], axis=-1).astype(jnp.bfloat16)
    w = jnp.concatenate([params["w1"].T, params["w2"].T], axis=0).astype(jnp.bfloat16)
    pre = jnp.einsum("bsk,kh->bsh", x, w, preferred_element_type=jnp.float32)
    pre = pre + (params["b1"] + params["b2"])
    t = jnp.tanh(pre)
    logits = jnp.einsum("bsh,h->bs", t, params["v"][0]) + params["bv"][0]
    pointer = jnp.argmax(logits, axis=1).astype(jnp.int32)
    return logits, pointer


if __name__ == "__main__":
    # Module-consistent small shapes: attention hidden H=32 (fixed), encoder/
    # decoder hidden 32, seq 8.  Case 1 exercises a 2-step "parallel" grid,
    # case 2 the tiny-batch full-block path.
    H = 32
    E = D = 32

    key = jax.random.PRNGKey(0)
    k_w1, k_b1, k_w2, k_b2, k_v, k_bv, k_data = jax.random.split(key, 7)
    params = {
        "w1": jax.random.normal(k_w1, (H, E), dtype=jnp.float32) * 0.1,  # Linear(E, 32)
        "b1": jax.random.normal(k_b1, (H,), dtype=jnp.float32) * 0.1,
        "w2": jax.random.normal(k_w2, (H, D), dtype=jnp.float32) * 0.1,  # Linear(D, 32)
        "b2": jax.random.normal(k_b2, (H,), dtype=jnp.float32) * 0.1,
        "v":  jax.random.normal(k_v, (1, H), dtype=jnp.float32) * 0.1,   # Linear(32, 1)
        "bv": jax.random.normal(k_bv, (1,), dtype=jnp.float32) * 0.1,
    }

    def run_case(B, S, batch_block, subkey):
        k_enc, k_dec = jax.random.split(subkey)
        enc = jax.random.normal(k_enc, (B, S, E), dtype=jnp.float32)
        dec = jax.random.normal(k_dec, (B, 1, D), dtype=jnp.float32)

        logits, pointer = attention_forward(dec, enc, params, batch_block=batch_block)
        jax.block_until_ready((logits, pointer))

        ref_l, ref_p = _reference_bf16_matmul(dec, enc, params)
        f32_l, _ = _reference_f32(dec, enc, params)

        assert logits.shape == (B, S) and pointer.shape == (B,)
        assert jnp.allclose(logits, ref_l, atol=1e-4, rtol=1e-4), "vs matched bf16 ref"
        assert jnp.array_equal(pointer, ref_p), "pointer mismatch"
        assert jnp.allclose(logits, f32_l, atol=5e-2, rtol=0.0), "vs full-f32 ref"

    k1, k2 = jax.random.split(k_data)
    run_case(B=16, S=8, batch_block=8, subkey=k1)     # gridded, 2 parallel blocks
    run_case(B=2, S=8, batch_block=None, subkey=k2)   # tiny batch, single block

    print("KERNEL_OK")
</pallas_src>

<mosaic_0001>
module attributes {stable_mosaic.version = 11 : i64} {
  func.func @_attention_kernel(%arg0: i32, %arg1: memref<64x64xbf16, #tpu.memory_space<vmem>>, %arg2: memref<64x32xbf16, #tpu.memory_space<vmem>>, %arg3: memref<2x32xf32, #tpu.memory_space<vmem>>, %arg4: memref<1xf32, #tpu.memory_space<smem>>, %arg5: memref<8x8xf32, #tpu.memory_space<vmem>>, %arg6: memref<8x1xi32, #tpu.memory_space<vmem>>) attributes {dimension_semantics = [#tpu.dimension_semantics<parallel>], iteration_bounds = array<i64: 2>, scalar_prefetch = 0 : i64, scratch_operands = 0 : i64, tpu.core_type = #tpu.core_type<tc>, window_params = [{transform_indices = @transform_0, window_bounds = array<i64: 64, 64>}, {pipeline_mode = #tpu.pipeline_mode<synchronous>, transform_indices = @transform_1, window_bounds = array<i64: 64, 32>}, {pipeline_mode = #tpu.pipeline_mode<synchronous>, transform_indices = @transform_2, window_bounds = array<i64: 2, 32>}, {transform_indices = @transform_3, window_bounds = array<i64: 1>}, {transform_indices = @transform_4, window_bounds = array<i64: 8, 8>}, {transform_indices = @transform_5, window_bounds = array<i64: 8, 1>}]} {
    %c0 = arith.constant 0 : index
    %c0_0 = arith.constant 0 : index
    %0 = vector.load %arg1[%c0, %c0_0] : memref<64x64xbf16, #tpu.memory_space<vmem>>, vector<64x64xbf16>
    %c0_1 = arith.constant 0 : index
    %c0_2 = arith.constant 0 : index
    %1 = vector.load %arg2[%c0_1, %c0_2] : memref<64x32xbf16, #tpu.memory_space<vmem>>, vector<64x32xbf16>
    %cst = arith.constant dense<0.000000e+00> : vector<64x32xf32>
    %2 = tpu.matmul %0, %1, %cst {dimension_numbers = #tpu.dot_dimension_numbers<[1], [0], [0], [1], [0, 0, 1, 1], [], []>} : vector<64x64xbf16>, vector<64x32xbf16>, vector<64x32xf32> -> vector<64x32xf32>
    %c0_3 = arith.constant 0 : index
    %c0_4 = arith.constant 0 : index
    %3 = vector.load %arg3[%c0_3, %c0_4] : memref<2x32xf32, #tpu.memory_space<vmem>>, vector<1x32xf32>
    %4 = vector.broadcast %3 : vector<1x32xf32> to vector<64x32xf32>
    %5 = arith.addf %2, %4 : vector<64x32xf32>
    %6 = math.tanh %5 : vector<64x32xf32>
    %7 = vector.shape_cast %6 : vector<64x32xf32> to vector<8x8x32xf32>
    %c1 = arith.constant 1 : index
    %c0_5 = arith.constant 0 : index
    %8 = vector.load %arg3[%c1, %c0_5] : memref<2x32xf32, #tpu.memory_space<vmem>>, vector<1x32xf32>
    %9 = vector.shape_cast %8 : vector<1x32xf32> to vector<1x1x32xf32>
    %10 = vector.broadcast %9 : vector<1x1x32xf32> to vector<8x8x32xf32>
    %11 = arith.mulf %7, %10 : vector<8x8x32xf32>
    %cst_6 = arith.constant dense<0.000000e+00> : vector<8x8xf32>
    %12 = vector.multi_reduction <add>, %11, %cst_6 [2] : vector<8x8x32xf32> to vector<8x8xf32>
    %c0_7 = arith.constant 0 : index
    %13 = memref.load %arg4[%c0_7] : memref<1xf32, #tpu.memory_space<smem>>
    %14 = vector.broadcast %13 : f32 to vector<8x8xf32>
    %15 = arith.addf %12, %14 : vector<8x8xf32>
    %c0_8 = arith.constant 0 : index
    %c0_9 = arith.constant 0 : index
    %16 = vector.load %arg5[%c0_8, %c0_9] : memref<8x8xf32, #tpu.memory_space<vmem>>, vector<8x8xf32>
    tpu.vector_store %arg5[%c0_8, %c0_9], %15 {strides = array<i32>} : memref<8x8xf32, #tpu.memory_space<vmem>>, vector<8x8xf32>,
    %cst_10 = arith.constant dense<0xFF800000> : vector<8xf32>
    %17 = vector.multi_reduction <maximumf>, %15, %cst_10 [1] : vector<8x8xf32> to vector<8xf32>
    %18 = vector.shape_cast %17 : vector<8xf32> to vector<8x1xf32>
    %19 = tpu.iota {dimensions = array<i32: 1>} : vector<8x8xi32>
    %20 = vector.broadcast %18 : vector<8x1xf32> to vector<8x8xf32>
    %21 = arith.cmpf oge, %15, %20 : vector<8x8xf32>
    %c8_i32 = arith.constant 8 : i32
    %22 = vector.broadcast %c8_i32 : i32 to vector<8x8xi32>
    %23 = arith.select %21, %19, %22 : vector<8x8xi1>, vector<8x8xi32>
    %cst_11 = arith.constant dense<2147483647> : vector<8xi32>
    %24 = vector.multi_reduction <minsi>, %23, %cst_11 [1] : vector<8x8xi32> to vector<8xi32>
    %25 = vector.shape_cast %24 : vector<8xi32> to vector<8x1xi32>
    %c0_12 = arith.constant 0 : index
    %c0_13 = arith.constant 0 : index
    %26 = vector.load %arg6[%c0_12, %c0_13] : memref<8x1xi32, #tpu.memory_space<vmem>>, vector<8x1xi32>
    tpu.vector_store %arg6[%c0_12, %c0_13], %25 {strides = array<i32>} : memref<8x1xi32, #tpu.memory_space<vmem>>, vector<8x1xi32>,
    return
  }
  func.func @transform_0(%arg0: i32) -> (i32, i32) {
    %c0_i32 = arith.constant 0 : i32
    %c0_i32_0 = arith.constant 0 : i32
    return %arg0, %c0_i32 : i32, i32
  }
  func.func @transform_1(%arg0: i32) -> (i32, i32) {
    %c0_i32 = arith.constant 0 : i32
    %c0_i32_0 = arith.constant 0 : i32
    %c0_i32_1 = arith.constant 0 : i32
    return %c0_i32, %c0_i32_0 : i32, i32
  }
  func.func @transform_2(%arg0: i32) -> (i32, i32) {
    %c0_i32 = arith.constant 0 : i32
    %c0_i32_0 = arith.constant 0 : i32
    %c0_i32_1 = arith.constant 0 : i32
    return %c0_i32, %c0_i32_0 : i32, i32
  }
  func.func @transform_3(%arg0: i32) -> i32 {
    %c0_i32 = arith.constant 0 : i32
    %c0_i32_0 = arith.constant 0 : i32
    return %c0_i32 : i32
  }
  func.func @transform_4(%arg0: i32) -> (i32, i32) {
    %c0_i32 = arith.constant 0 : i32
    %c0_i32_0 = arith.constant 0 : i32
    return %arg0, %c0_i32 : i32, i32
  }
  func.func @transform_5(%arg0: i32) -> (i32, i32) {
    %c0_i32 = arith.constant 0 : i32
    %c0_i32_0 = arith.constant 0 : i32
    return %arg0, %c0_i32 : i32, i32
  }
}

</mosaic_0001>

<bundles_post_ra>
// kernel: tpu_custom_call.1
= control target key start
LH: loop header
LB: loop body
LE: loop exit
PB: predicated region body
PF: predicated region fallthrough
CT: control target
= control target key end

     0   :  { %s857_s20 = smov 0   ;;  %s977_s0 = inlined_call_operand.vmem [shape: bf16[128,64], index: 0, kind: input, shape index: {}]   ;;  %s978_s1 = inlined_call_operand.vmem [shape: bf16[64,32], index: 1, kind: input, shape index: {}]   ;;  %s979_s2 = inlined_call_operand.vmem [shape: f32[2,32], index: 2, kind: input, shape index: {}]   ;;  %s980_s3 = inlined_call_operand.<no memory space> [shape: f32[1], index: 3, kind: input, shape index: {}]   ;;  %s981_s4 = inlined_call_operand.vmem [shape: f32[16,8], index: 4, kind: output, shape index: {0}]   ;;  %s982_s5 = inlined_call_operand.vmem [shape: s32[16,1], index: 5, kind: output, shape index: {1}]  }
   0x1   :  { %11 = sst [smem:[#allocation2]] %s980_s3 }
   0x2 LB: > { %s863_s21 = sadd.s32 4294967295, %s821_s20   ;;  %p727_p0 = scmp.ge.s32.totalorder %s821_s20, 1  ;;  %s821_s20 = sphi %s857_s20, %s17_s20  }
   0x3   : > { %p192_p1 = scmp.lt.s32.totalorder %s821_s20, 3 }
   0x5   : > { %p193_p2 = pnand %p727_p0, %p192_p1 }
   0x6   : > { %v791_v0 = vld [vmem:[%s978_s1] sm:$0xff] (!%p193_p2)   ;;  %s728_s3 = sshll.u32 (!%p193_p2), %s863_s21, 3  ;;  %v792_v1 = vld [vmem:[%s978_s1 + $0x8] sm:$0xff] (!%p193_p2)   ;;  %v793_v2 = vld [vmem:[%s978_s1 + $0x10] sm:$0xff] (!%p193_p2)   ;;  %vm303_vm0 = vcmask (!%p193_p2), 523264   ;;  %vm402_vm1 = vcmask (!%p193_p2), 261120   ;;  %v445_v50 = vlaneseq (!%p193_p2) }
   0x7   : > { %196 = sbr.rel (%p193_p2) target bundleno = 1010 (0x3f2), region = 36  ;;  %p224_p3 = scmp.lt.s32.totalorder (!%p193_p2), %s728_s3, 15  ;;  %756 = vmatprep.subr.bf16.mxu0 (!%p193_p2), %v791_v0  ;;  %772 = vmatprep.subr.bf16.mxu1 (!%p193_p2), %v791_v0  ;;  %v794_v4 = vld [vmem:[%s978_s1 + $0x18] sm:$0xff] (!%p193_p2)   ;;  %v732_v8 = vld [vmem:[%s979_s2] ss:$0 sm:$0xff] (!%p193_p2)  ;;  %vm479_vm2 = vcmask (!%p193_p2), 1041409  }
   0x8   : > { %757 = vmatpush3.bf16.msra.mxu0 (!%p193_p2), %v791_v0  ;;  %776 = vmatpush3.bf16.msra.mxu1 (!%p193_p2), %v791_v0  ;;  %v745_v25 = vld [vmem:[%s979_s2 + $0x1] ss:$0 sm:$0xff] (!%p193_p2)  ;;  %v446_v51 = vand.u32 (!%p193_p2), 127, %v445_v50  ;;  %s427_s13 = sld [smem:[#allocation2]] (!%p193_p2)  ;;  %v901_v52 = vshrl.u32 (!%p193_p2), %v445_v50, 7  ;;  %p229_p4 = scmp.lt.s32.totalorder (!%p193_p2), %s863_s21, 1 }
   0x9   : > { %758 = vmatprep.subr.bf16.mxu0 (!%p193_p2), %v792_v1  ;;  %773 = vmatprep.subr.bf16.mxu1 (!%p193_p2), %v792_v1  ;;  %vm481_vm3 = vcmask (!%p193_p2), 1042434   ;;  %vm483_vm4 = vcmask (!%p193_p2), 1043459   ;;  %vm485_vm5 = vcmask (!%p193_p2), 1044484   ;;  %vm487_vm6 = vcmask (!%p193_p2), 1045509  }
   0xa   : > { %v904_v56 = vsub.s32 (!%p193_p2), %v446_v51, %v901_v52  ;;  %vm489_vm7 = vcmask (!%p193_p2), 1046534   ;;  %vm491_vm8 = vcmask (!%p193_p2), 1047559   ;;  %vm494_vm9 = vcmask (!%p193_p2), 64512  }
   0xc   : > { %759 = vmatpush3.bf16.msra.mxu0 (!%p193_p2), %v792_v1  ;;  %777 = vmatpush3.bf16.msra.mxu1 (!%p193_p2), %v792_v1 }
   0xd   : > { %760 = vmatprep.subr.bf16.mxu0 (!%p193_p2), %v793_v2  ;;  %774 = vmatprep.subr.bf16.mxu1 (!%p193_p2), %v793_v2 }
   0xe   : > { %s984_s3 = smov (!%p224_p3, %s728_s3), 15  ;;  %v428_v54 = vstv %s427_s13  ;;  %s986_s21 = smov (!%p229_p4, %s863_s21), 1 }
   0xf   : > { %s729_s28 = sshll.u32 %s984_s3, 2  ;;  %s730_s14 = sshll.u32 %s986_s21, 3 }
  0x10   : > { %s227_s6 = scalar_lea.vmem %s977_s0, %s729_s28  ;;  %761 = vmatpush3.bf16.msra.mxu0 %v793_v2  ;;  %778 = vmatpush3.bf16.msra.mxu1 %v793_v2  ;;  %s232_s17 = scalar_lea.vmem %s981_s4, %s730_s14 }
  0x11   : > { %v795_v3 = vld [vmem:[%s227_s6] sm:$0xff]   ;;  %v797_v5 = vld [vmem:[%s227_s6 + $0x10] sm:$0xff]   ;;  %762 = vmatprep.subr.bf16.mxu0 %v794_v4  ;;  %775 = vmatprep.subr.bf16.mxu1 %v794_v4  ;;  %v796_v6 = vld [vmem:[%s227_s6 + $0x8] sm:$0xff]   ;;  %s236_s22 = scalar_lea.vmem %s982_s5, %s730_s14 }
  0x12   : > { %764 = vmatprep.mubr.msk.bf16.mxu0 %vm303_vm0, %v795_v3  ;;  %768 = vmatprep.mubr.msk.bf16.mxu1 %vm303_vm0, %v797_v5  ;;  %v798_v7 = vld [vmem:[%s227_s6 + $0x18] sm:$0xff]  }
  0x14   : > { %763 = vmatpush3.bf16.msra.mxu0 %v794_v4  ;;  %779 = vmatpush3.bf16.msra.mxu1 %v794_v4 }
  0x17   : > { %765 = vmatmul.mubr.msk.bf16.vlgmr.msra.gmra.mrb[0].mxu0 %vm303_vm0, %v796_v6  ;;  %769 = vmatmul.mubr.msk.bf16.vlgmr.msra.gmra.mrb[0].mxu1 %vm303_vm0, %v798_v7 }
  0xea   : > { %v766_v9 = vpop.f32.mrb[0].mxu0  ;;  %v770_v10 = vpop.f32.mrb[0].mxu1 }
  0xeb   : > { %v359_v11 = vadd.f32 %v766_v9, %v732_v8  ;;  %v350_v12 = vpop.f32.mrb[1].mxu0  ;;  %v366_v13 = vpop.f32.mrb[1].mxu1  ;;  %v375_v24 = vadd.f32 %v770_v10, %v732_v8 }
  0xec   : > { %v351_v14 = vadd.f32 %v732_v8, %v350_v12  ;;  %v767_v15 = vpop.f32.mrb[2].mxu0  ;;  %v771_v16 = vpop.f32.mrb[2].mxu1  ;;  %v367_v21 = vadd.f32 %v732_v8, %v366_v13 }
  0xed   : > { %799 = vtanh.f32 %v359_v11  ;;  %v362_v17 = vadd.f32 %v767_v15, %v732_v8  ;;  %v353_v18 = vpop.f32.mrb[3].mxu0  ;;  %v369_v19 = vpop.f32.mrb[3].mxu1  ;;  %v378_v23 = vadd.f32 %v771_v16, %v732_v8 }
  0xee   : > { %801 = vtanh.f32 %v351_v14  ;;  %v354_v20 = vadd.f32 %v732_v8, %v353_v18  ;;  %v370_v22 = vadd.f32 %v732_v8, %v369_v19 }
  0xef   : > { %803 = vtanh.f32 %v362_v17 }
  0xf0   : > { %805 = vtanh.f32 %v354_v20 }
  0xf1   : > { %807 = vtanh.f32 %v367_v21 }
  0xf2   : > { %809 = vtanh.f32 %v370_v22 }
  0xf3   : > { %811 = vtanh.f32 %v378_v23  ;;  %v823_v23 = vmov 0  }
  0xf4   : > { %813 = vtanh.f32 %v375_v24  ;;  %790 = vset.pattern.permute.xlu1 %v823_v23  ;;  %789 = vset.pattern.permute.xlu0 %v823_v23  ;;  %v506_v24 = vsub.s32 1, %v901_v52 }
  0xf7   : > { %v800_v26 = vpop.eup %799 }
  0xf8   : > { %v802_v27 = vpop.eup %801  ;;  %v396_v28 = vmul.f32 %v800_v26, %v745_v25  ;;  %v510_v26 = vsub.s32 2, %v901_v52 }
  0xf9   : > { %v804_v29 = vpop.eup %803  ;;  %v394_v30 = vmul.f32 %v802_v27, %v745_v25 }
  0xfa   : > { %v806_v31 = vpop.eup %805  ;;  %v409_v32 = vsel %vm402_vm1, %v396_v28, 0.0  ;;  %v397_v33 = vmul.f32 %v804_v29, %v745_v25 }
  0xfb   : > { %410 = vadd.xlane.f32.xlu1 %v409_v32  ;;  %v403_v34 = vsel %vm402_vm1, %v394_v30, 0.0  ;;  %v395_v35 = vmul.f32 %v806_v31, %v745_v25  ;;  %v808_v36 = vpop.eup %807  ;;  %v514_v32 = vsub.s32 3, %v901_v52 }
  0xfc   : > { %404 = vadd.xlane.f32.xlu0 %v403_v34  ;;  %v810_v37 = vpop.eup %809  ;;  %v412_v38 = vsel %vm402_vm1, %v397_v33, 0.0  ;;  %v398_v42 = vmul.f32 %v808_v36, %v745_v25  ;;  %v518_v36 = vsub.s32 4, %v901_v52 }
  0xfd   : > { %v812_v39 = vpop.eup %811  ;;  %v406_v40 = vsel %vm402_vm1, %v395_v35, 0.0  ;;  %v399_v41 = vmul.f32 %v810_v37, %v745_v25 }
  0xfe   : > { %v814_v43 = vpop.eup %813  ;;  %v401_v45 = vmul.f32 %v812_v39, %v745_v25  ;;  %v415_v46 = vsel %vm402_vm1, %v398_v42, 0.0  ;;  %v522_v39 = vsub.s32 5, %v901_v52  ;;  %v526_v42 = vsub.s32 6, %v901_v52 }
  0xff   : > { %413 = vadd.xlane.f32.xlu1 %v412_v38  ;;  %v418_v44 = vsel %vm402_vm1, %v399_v41, 0.0  ;;  %v400_v47 = vmul.f32 %v814_v43, %v745_v25  ;;  %v502_v25 = vsub.s32 0, %v901_v52 }
 0x100   : > { %407 = vadd.xlane.f32.xlu0 %v406_v40  ;;  %v424_v48 = vsel %vm402_vm1, %v401_v45, 0.0  ;;  %v530_v45 = vsub.s32 7, %v901_v52 }
 0x101   : > { %v421_v49 = vsel %vm402_vm1, %v400_v47, 0.0 }
 0x103   : > { %419 = vadd.xlane.f32.xlu1 %v418_v44 }
 0x104   : > { %416 = vadd.xlane.f32.xlu0 %v415_v46 }
 0x107   : > { %425 = vadd.xlane.f32.xlu1 %v424_v48 }
 0x108   : > { %422 = vadd.xlane.f32.xlu0 %v421_v49 }
 0x118   : > { %549 = vbcast.lane.b32.xlu1 %v446_v51, 256 }
 0x188   : > { %v411_v53 = vpop.xlane.xlu1 %410 }
 0x189   : > { %v405_v55 = vpop.xlane.xlu0 %404  ;;  %v906_v59 = vadd.f32 %v428_v54, %v411_v53 }
 0x18a   : > { %v429_v57 = vadd.f32 %v428_v54, %v405_v55 }
 0x18b   : > { %v458_v2 = vrot.slane %v906_v59, %v904_v56 }
 0x18c   : > { %v414_v58 = vpop.xlane.xlu1 %413  ;;  %v450_v63 = vrot.slane %v429_v57, %v904_v56 }
 0x18d   : > { %v408_v60 = vpop.xlane.xlu0 %407  ;;  %v908_v61 = vadd.f32 %v428_v54, %v414_v58 }
 0x18e   : > { %v430_v62 = vadd.f32 %v428_v54, %v408_v60 }
 0x18f   : > { %v462_v4 = vrot.slane %v908_v61, %v904_v56 }
 0x190   : > { %v454_v0 = vrot.slane %v430_v62, %v904_v56  ;;  %v420_v1 = vpop.xlane.xlu1 %419 }
 0x191   : > { %v417_v3 = vpop.xlane.xlu0 %416  ;;  %v434_v8 = vadd.f32 %v428_v54, %v420_v1 }
 0x192   : > { %v480_v5 = vsel %vm479_vm2, %v454_v0, %v450_v63  ;;  %v433_v6 = vadd.f32 %v428_v54, %v417_v3 }
 0x193   : > { %v482_v7 = vsel %vm481_vm3, %v458_v2, %v480_v5  ;;  %v470_v16 = vrot.slane %v434_v8, %v904_v56 }
 0x194   : > { %v484_v9 = vsel %vm483_vm4, %v462_v4, %v482_v7  ;;  %v466_v10 = vrot.slane %v433_v6, %v904_v56  ;;  %v426_v11 = vpop.xlane.xlu1 %425 }
 0x195   : > { %v924_v12 = vadd.f32 %v428_v54, %v426_v11  ;;  %v423_v13 = vpop.xlane.xlu0 %422 }
 0x196   : > { %v486_v14 = vsel %vm485_vm5, %v466_v10, %v484_v9  ;;  %v435_v15 = vadd.f32 %v428_v54, %v423_v13 }
 0x197   : > { %v478_v18 = vrot.slane %v924_v12, %v904_v56  ;;  %v488_v19 = vsel %vm487_vm6, %v470_v16, %v486_v14 }
 0x198   : > { %v474_v17 = vrot.slane %v435_v15, %v904_v56  ;;  %v550_v28 = vpop.permute.xlu1 %549 }
 0x19a   : > { %v490_v20 = vsel %vm489_vm7, %v474_v17, %v488_v19 }
 0x19b   : > { %v492_v21 = vsel %vm491_vm8, %v478_v18, %v490_v20 }
 0x19c   : > { %v496_v22 = vsel %vm494_vm9, %v492_v21, -inf  ;;  %495 = vst.msk [vmem:[%s232_s17] sm:$0xff] %vm494_vm9, %v492_v21 }
 0x19d   : > { %497 = vmax.xlane.f32.xlu0 %v496_v22 }
 0x22a   : > { %v498_v27 = vpop.xlane.xlu0 %497 }
 0x22b   : > { %v507_v29 = vrot.slane %v498_v27, %v506_v24  ;;  %v503_v30 = vrot.slane %v498_v27, %v502_v25  ;;  %v511_v31 = vrot.slane %v498_v27, %v510_v26  ;;  %v515_v35 = vrot.slane %v498_v27, %v514_v32 }
 0x22c   : > { %v519_v38 = vrot.slane %v498_v27, %v518_v36  ;;  %v523_v41 = vrot.slane %v498_v27, %v522_v39  ;;  %v527_v44 = vrot.slane %v498_v27, %v526_v42  ;;  %v531_v47 = vrot.slane %v498_v27, %v530_v45 }
 0x22d   : > { %vm541_vm10 = vcmp.ge.f32.partialorder %v430_v62, %v507_v29  ;;  %vm540_vm11 = vcmp.ge.f32.partialorder %v429_v57, %v503_v30  ;;  %vm542_vm12 = vcmp.ge.f32.partialorder %v906_v59, %v511_v31  ;;  %vm543_vm13 = vcmp.ge.f32.partialorder %v908_v61, %v515_v35 }
 0x22e   : > { %v552_v33 = vsel %vm541_vm10, %v550_v28, 8  ;;  %v551_v34 = vsel %vm540_vm11, %v550_v28, 8  ;;  %v553_v37 = vsel %vm542_vm12, %v550_v28, 8  ;;  %v554_v40 = vsel %vm543_vm13, %v550_v28, 8 }
 0x22f   : > { %563 = vperm.xlu1 %790, %v552_v33   ;;  %560 = vperm.xlu0 %789, %v551_v34   ;;  %vm544_vm14 = vcmp.ge.f32.partialorder %v433_v6, %v519_v38  ;;  %vm545_vm15 = vcmp.ge.f32.partialorder %v434_v8, %v523_v41  ;;  %vm546_vm0 = vcmp.ge.f32.partialorder %v435_v15, %v527_v44 }
 0x230   : > { %v555_v43 = vsel %vm544_vm14, %v550_v28, 8  ;;  %v556_v46 = vsel %vm545_vm15, %v550_v28, 8  ;;  %v557_v48 = vsel %vm546_vm0, %v550_v28, 8  ;;  %vm547_vm1 = vcmp.ge.f32.partialorder %v924_v12, %v531_v47 }
 0x231   : > { %v558_v49 = vsel %vm547_vm1, %v550_v28, 8 }
 0x233   : > { %566 = vperm.xlu1 %790, %v553_v37  }
 0x237   : > { %569 = vperm.xlu1 %790, %v554_v40  }
 0x23b   : > { %572 = vperm.xlu1 %790, %v555_v43  }
 0x23f   : > { %575 = vperm.xlu1 %790, %v556_v46  }
 0x243   : > { %578 = vperm.xlu1 %790, %v557_v48  }
 0x247   : > { %581 = vperm.xlu1 %790, %v558_v49  }
 0x2ae   : > { %v564_v50 = vpop.permute.xlu1 %563  ;;  %v561_v55 = vpop.permute.xlu0 %560 }
 0x2af   : > { %v590_v58 = vrot.slane %v564_v50, %v904_v56  ;;  %v586_v52 = vrot.slane %v561_v55, %v904_v56 }
 0x2b1   : > { %v615_v63 = vsel %vm479_vm2, %v590_v58, %v586_v52 }
 0x2b2   : > { %v567_v51 = vpop.permute.xlu1 %566 }
 0x2b3   : > { %v594_v59 = vrot.slane %v567_v51, %v904_v56 }
 0x2b5   : > { %v616_v1 = vsel %vm481_vm3, %v594_v59, %v615_v63  ;;  %vm637_vm3 = vcmask 7168  }
 0x2b6   : > { %v570_v53 = vpop.permute.xlu1 %569 }
 0x2b7   : > { %v598_v60 = vrot.slane %v570_v53, %v904_v56 }
 0x2b9   : > { %v617_v3 = vsel %vm483_vm4, %v598_v60, %v616_v1 }
 0x2ba   : > { %v573_v54 = vpop.permute.xlu1 %572 }
 0x2bb   : > { %v602_v61 = vrot.slane %v573_v54, %v904_v56 }
 0x2bd   : > { %v618_v4 = vsel %vm485_vm5, %v602_v61, %v617_v3 }
 0x2be   : > { %v576_v57 = vpop.permute.xlu1 %575 }
 0x2bf   : > { %v606_v0 = vrot.slane %v576_v57, %v904_v56 }
 0x2c1   : > { %v619_v6 = vsel %vm487_vm6, %v606_v0, %v618_v4 }
 0x2c2   : > { %v579_v62 = vpop.permute.xlu1 %578 }
 0x2c3   : > { %v610_v2 = vrot.slane %v579_v62, %v904_v56 }
 0x2c5   : > { %v620_v8 = vsel %vm489_vm7, %v610_v2, %v619_v6 }
 0x2c6   : > { %v582_v5 = vpop.permute.xlu1 %581 }
 0x2c7   : > { %v614_v7 = vrot.slane %v582_v5, %v904_v56 }
 0x2c9   : > { %v621_v9 = vsel %vm491_vm8, %v614_v7, %v620_v8 }
 0x2ca   : > { %v622_v10 = vsel %vm494_vm9, %v621_v9, 2147483647 }
 0x2cb   : > { %v624_v11 = vshra.s32 %v622_v10, 16  ;;  %v623_v13 = vand.u32 65535, %v622_v10 }
 0x2cd   : > { %v626_v12 = vcvt.s32.f32 %v624_v11  ;;  %v625_v15 = vcvt.s32.f32 %v623_v13 }
 0x2cf   : > { %627 = vmin.xlane.f32.xlu1 %v626_v12 }
 0x35c   : > { %v628_v14 = vpop.xlane.xlu1 %627 }
 0x35d   : > { %vm629_vm2 = vcmp.eq.f32.partialorder %v626_v12, %v628_v14  ;;  %v634_v17 = vcvt.f32.s32 %v628_v14 }
 0x35e   : > { %v630_v16 = vsel %vm629_vm2, %v625_v15, inf }
 0x35f   : > { %631 = vmin.xlane.f32.xlu0 %v630_v16  ;;  %v635_v19 = vshll.u32 %v634_v17, 16 }
 0x3ec   : > { %v632_v18 = vpop.xlane.xlu0 %631 }
 0x3ed   : > { %v633_v56 = vcvt.f32.s32 %v632_v18 }
 0x3ef   : > { %v636_v20 = vadd.s32 %v635_v19, %v633_v56 }
 0x3f1   : > { %638 = vst.msk [vmem:[%s236_s22] sm:$0xff] %vm637_vm3, %v636_v20 }
 0x3f2 PF: > { %s17_s20 = sadd.s32 1, %s821_s20  }
 0x3f3   : > { %p14_p5 = scmp.ge.s32.totalorder %s17_s20, 4  }
 0x3f5   :  { %16 = sbr.rel (!%p14_p5) target bundleno = 2 (0x2), region = 78 }

</bundles_post_ra>
